<compile_context>
chip_gen: v7x
topology: tpu7x:2x2x1
jax: 0.10.0
libtpu: 0.0.40
codegen_flags: <defaults>
</compile_context>

<pallas_src>
import functools
import math

import jax
import jax.numpy as jnp
from jax.experimental import pallas as pl
from jax.experimental.pallas import tpu as pltpu


def _round_up(x, m):
    return ((x + m - 1) // m) * m


def _fused_mlp_kernel(x_ref, *refs, apply_gelu, residual):
    """Fused MLP on one batch tile: all layers, activation kept on-chip.

    refs = (w0, b0, w1, b1, ..., o_ref). `apply_gelu` / `residual` are static
    per-layer bool tuples baked in via functools.partial.
    """
    o_ref = refs[-1]
    params = refs[:-1]
    n_layers = len(apply_gelu)
    inv_sqrt2 = jnp.float32(1.0 / math.sqrt(2.0))

    h = x_ref[...].astype(jnp.float32)
    for l in range(n_layers):
        w = params[2 * l][...].astype(jnp.float32)
        b = params[2 * l + 1][...].astype(jnp.float32)
        nxt = jnp.dot(h, w, preferred_element_type=jnp.float32) + b
        if apply_gelu[l]:
            # Exact GELU (torch F.gelu default): 0.5*x*(1+erf(x/sqrt(2)))
            nxt = 0.5 * nxt * (1.0 + jax.lax.erf(nxt * inv_sqrt2))
        if residual[l]:
            nxt = nxt + h
        h = nxt
    o_ref[...] = h.astype(o_ref.dtype)


def _choose_tile_m(rows, d_max, param_bytes):
    """Largest batch tile (multiple of 8) that stays well inside scoped VMEM."""
    budget = 12 * 1024 * 1024  # conservative: fits v5e/v6e/v7x scoped defaults
    tile = 8
    for cand in (2048, 1024, 512, 256, 128, 64, 32, 16, 8):
        io_bytes = 2 * 2 * cand * d_max * 4  # in+out tiles, double-buffered, f32
        if io_bytes + 2 * param_bytes <= budget:
            tile = cand
            break
    return max(8, min(tile, _round_up(max(rows, 1), 8)))


def mlp_forward(x, weights, biases, *, short_cut=False):
    """Forward pass matching MultiLayerPerceptron.forward (batch_norm/dropout off).

    weights[i]: [dims[i], dims[i+1]] (torch Linear weight transposed)
    biases[i] : [1, dims[i+1]]
    GELU after every layer except the last; residual when short_cut and the
    layer is square (hidden.shape == layer_input.shape in the torch code).
    """
    n_layers = len(weights)
    dims = [weights[0].shape[0]] + [w.shape[1] for w in weights]
    out_dim = dims[-1]

    lead_shape = x.shape[:-1]
    x2 = x.reshape(-1, dims[0])
    n = x2.shape[0]

    apply_gelu = tuple(l < n_layers - 1 for l in range(n_layers))
    # torch gate `hidden.shape == layer_input.shape` reduces to D_in == D_out.
    residual = tuple(short_cut and dims[l] == dims[l + 1] for l in range(n_layers))

    # ---- lane-dense packing (block-diagonal weight trick) -------------------
    d = dims[0]
    can_pack = all(dd == d for dd in dims) and d < 128 and (128 % d == 0) and n > 0
    if can_pack:
        p = 128 // d
        eye_p = jnp.eye(p, dtype=weights[0].dtype)
        ws = [jnp.kron(eye_p, w) for w in weights]        # block-diag, 128-wide
        bs = [jnp.tile(b, (1, p)) for b in biases]        # bias repeated p times
    else:
        p = 1
        ws = list(weights)
        bs = list(biases)

    d_first = p * dims[0]
    d_last = ws[-1].shape[1]
    d_max = max([d_first] + [w.shape[1] for w in ws])
    param_bytes = int(sum(w.size + b.size for w, b in zip(ws, bs))) * 4

    rows = max(-(-max(n, 1) // p), 1)                     # packed row count
    tile_m = _choose_tile_m(rows, d_max, param_bytes)
    rows_pad = _round_up(rows, tile_m)

    # Single pad covering both pack remainder and tile remainder.
    n_needed = rows_pad * p
    if n_needed != n:
        x2 = jnp.pad(x2, ((0, n_needed - n), (0, 0)))
    xk = x2.reshape(rows_pad, d_first)

    kernel = functools.partial(
        _fused_mlp_kernel, apply_gelu=apply_gelu, residual=residual
    )

    in_specs = [pl.BlockSpec((tile_m, d_first), lambda i: (i, 0))]
    args = [xk]
    for w, b in zip(ws, bs):
        in_specs.append(pl.BlockSpec(w.shape, lambda i: (0, 0)))  # resident weight
        in_specs.append(pl.BlockSpec(b.shape, lambda i: (0, 0)))  # resident bias
        args.append(w)
        args.append(b)

    out = pl.pallas_call(
        kernel,
        out_shape=jax.ShapeDtypeStruct((rows_pad, d_last), x.dtype),
        grid_spec=pltpu.PrefetchScalarGridSpec(
            num_scalar_prefetch=0,
            grid=(rows_pad // tile_m,),
            in_specs=in_specs,
            out_specs=pl.BlockSpec((tile_m, d_last), lambda i: (i, 0)),
        ),
        compiler_params=pltpu.CompilerParams(
            dimension_semantics=("parallel",),
            vmem_limit_bytes=32 * 1024 * 1024,
        ),
    )(*args)

    if can_pack:
        out = out.reshape(rows_pad * p, d)[:n]
    else:
        out = out[:n]
    return out.reshape(lead_shape + (out_dim,))


def _init_params(key, dims, dtype=jnp.float32):
    """Deterministic init mimicking nn.Linear default (uniform +/- 1/sqrt(fan_in))."""
    weights, biases = [], []
    for i in range(len(dims) - 1):
        key, kw, kb = jax.random.split(key, 3)
        bound = 1.0 / math.sqrt(dims[i])
        w = jax.random.uniform(kw, (dims[i], dims[i + 1]), dtype, -bound, bound)
        b = jax.random.uniform(kb, (1, dims[i + 1]), dtype, -bound, bound)
        weights.append(w)
        biases.append(b)
    return weights, biases


def _ref(x, ws, bs, short_cut):
    """Plain-JAX reference with identical semantics (erf GELU, square residual)."""
    h = x
    for i, (w, b) in enumerate(zip(ws, bs)):
        nxt = h @ w + b
        if i < len(ws) - 1:
            nxt = 0.5 * nxt * (1.0 + jax.lax.erf(nxt / jnp.sqrt(2.0)))
        if short_cut and nxt.shape == h.shape:
            nxt = nxt + h
        h = nxt
    return h


if __name__ == "__main__":
    # Module config: MultiLayerPerceptron(input_dim=32, hidden_dims=[32, 32],
    #                                     short_cut=True, batch_norm=False,
    #                                     activation='gelu', dropout=None)
    # TODO(synk): batch_norm / dropout branches are disabled in this config and
    # not implemented in the kernel.
    input_dim = 32
    hidden_dims = [32, 32]
    dims = [input_dim] + hidden_dims

    key = jax.random.PRNGKey(0)
    key, kx = jax.random.split(key)
    weights, biases = _init_params(key, dims)

    # main check: batch=8, short_cut=True (packed / lane-dense path)
    x = jax.random.normal(kx, (8, input_dim), jnp.float32)
    out = jax.block_until_ready(mlp_forward(x, weights, biases, short_cut=True))
    ref = _ref(x, weights, biases, True)
    assert out.shape == ref.shape
    assert jnp.allclose(out, ref, atol=1e-5, rtol=1e-5), "mismatch vs reference"

    # remainder-path check: batch not divisible by pack factor / tile, no residual
    x5 = jax.random.normal(jax.random.PRNGKey(1), (5, input_dim), jnp.float32)
    out5 = jax.block_until_ready(mlp_forward(x5, weights, biases, short_cut=False))
    ref5 = _ref(x5, weights, biases, False)
    assert out5.shape == ref5.shape
    assert jnp.allclose(out5, ref5, atol=1e-5, rtol=1e-5), "mismatch (remainder path)"

    # general (non-packable) path: mixed layer widths, leading batch dims
    dims_g = [32, 64, 16]
    wg, bg = _init_params(jax.random.PRNGKey(2), dims_g)
    xg = jax.random.normal(jax.random.PRNGKey(3), (2, 3, 32), jnp.float32)
    outg = jax.block_until_ready(mlp_forward(xg, wg, bg, short_cut=True))
    refg = _ref(xg.reshape(-1, 32), wg, bg, True).reshape(2, 3, 16)
    assert outg.shape == refg.shape
    assert jnp.allclose(outg, refg, atol=1e-5, rtol=1e-5), "mismatch (general path)"

    print("KERNEL_OK")
</pallas_src>

<mosaic_0001>
module attributes {stable_mosaic.version = 11 : i64} {
  func.func @_fused_mlp_kernel(%arg0: i32, %arg1: memref<8x128xf32, #tpu.memory_space<vmem>>, %arg2: memref<128x128xf32, #tpu.memory_space<vmem>>, %arg3: memref<1x128xf32, #tpu.memory_space<vmem>>, %arg4: memref<128x128xf32, #tpu.memory_space<vmem>>, %arg5: memref<1x128xf32, #tpu.memory_space<vmem>>, %arg6: memref<8x128xf32, #tpu.memory_space<vmem>>) attributes {dimension_semantics = [#tpu.dimension_semantics<parallel>], iteration_bounds = array<i64: 1>, scalar_prefetch = 0 : i64, scratch_operands = 0 : i64, tpu.core_type = #tpu.core_type<tc>, window_params = [{transform_indices = @transform_0, window_bounds = array<i64: 8, 128>}, {pipeline_mode = #tpu.pipeline_mode<synchronous>, transform_indices = @transform_1, window_bounds = array<i64: 128, 128>}, {pipeline_mode = #tpu.pipeline_mode<synchronous>, transform_indices = @transform_2, window_bounds = array<i64: 1, 128>}, {pipeline_mode = #tpu.pipeline_mode<synchronous>, transform_indices = @transform_3, window_bounds = array<i64: 128, 128>}, {pipeline_mode = #tpu.pipeline_mode<synchronous>, transform_indices = @transform_4, window_bounds = array<i64: 1, 128>}, {transform_indices = @transform_5, window_bounds = array<i64: 8, 128>}]} {
    %c0 = arith.constant 0 : index
    %c0_0 = arith.constant 0 : index
    %0 = vector.load %arg1[%c0, %c0_0] : memref<8x128xf32, #tpu.memory_space<vmem>>, vector<8x128xf32>
    %c0_1 = arith.constant 0 : index
    %c0_2 = arith.constant 0 : index
    %1 = vector.load %arg2[%c0_1, %c0_2] : memref<128x128xf32, #tpu.memory_space<vmem>>, vector<128x128xf32>
    %c0_3 = arith.constant 0 : index
    %c0_4 = arith.constant 0 : index
    %2 = vector.load %arg3[%c0_3, %c0_4] : memref<1x128xf32, #tpu.memory_space<vmem>>, vector<1x128xf32>
    %cst = arith.constant dense<0.000000e+00> : vector<8x128xf32>
    %3 = tpu.matmul %0, %1, %cst {dimension_numbers = #tpu.dot_dimension_numbers<[1], [0], [0], [1], [0, 0, 1, 1], [], []>} : vector<8x128xf32>, vector<128x128xf32>, vector<8x128xf32> -> vector<8x128xf32>
    %4 = vector.broadcast %2 : vector<1x128xf32> to vector<8x128xf32>
    %5 = arith.addf %3, %4 : vector<8x128xf32>
    %cst_5 = arith.constant 5.000000e-01 : f32
    %6 = vector.broadcast %cst_5 : f32 to vector<8x128xf32>
    %7 = arith.mulf %6, %5 : vector<8x128xf32>
    %cst_6 = arith.constant 0.707106769 : f32
    %8 = vector.broadcast %cst_6 : f32 to vector<8x128xf32>
    %9 = arith.mulf %5, %8 : vector<8x128xf32>
    %10 = math.erf %9 : vector<8x128xf32>
    %cst_7 = arith.constant 1.000000e+00 : f32
    %11 = vector.broadcast %cst_7 : f32 to vector<8x128xf32>
    %12 = arith.addf %11, %10 : vector<8x128xf32>
    %13 = arith.mulf %7, %12 : vector<8x128xf32>
    %14 = arith.addf %13, %0 : vector<8x128xf32>
    %c0_8 = arith.constant 0 : index
    %c0_9 = arith.constant 0 : index
    %15 = vector.load %arg4[%c0_8, %c0_9] : memref<128x128xf32, #tpu.memory_space<vmem>>, vector<128x128xf32>
    %c0_10 = arith.constant 0 : index
    %c0_11 = arith.constant 0 : index
    %16 = vector.load %arg5[%c0_10, %c0_11] : memref<1x128xf32, #tpu.memory_space<vmem>>, vector<1x128xf32>
    %cst_12 = arith.constant dense<0.000000e+00> : vector<8x128xf32>
    %17 = tpu.matmul %14, %15, %cst_12 {dimension_numbers = #tpu.dot_dimension_numbers<[1], [0], [0], [1], [0, 0, 1, 1], [], []>} : vector<8x128xf32>, vector<128x128xf32>, vector<8x128xf32> -> vector<8x128xf32>
    %18 = vector.broadcast %16 : vector<1x128xf32> to vector<8x128xf32>
    %19 = arith.addf %17, %18 : vector<8x128xf32>
    %20 = arith.addf %19, %14 : vector<8x128xf32>
    %c0_13 = arith.constant 0 : index
    %c0_14 = arith.constant 0 : index
    %21 = vector.load %arg6[%c0_13, %c0_14] : memref<8x128xf32, #tpu.memory_space<vmem>>, vector<8x128xf32>
    tpu.vector_store %arg6[%c0_13, %c0_14], %20 {strides = array<i32>} : memref<8x128xf32, #tpu.memory_space<vmem>>, vector<8x128xf32>,
    return
  }
  func.func @transform_0(%arg0: i32) -> (i32, i32) {
    %c0_i32 = arith.constant 0 : i32
    %c0_i32_0 = arith.constant 0 : i32
    return %arg0, %c0_i32 : i32, i32
  }
  func.func @transform_1(%arg0: i32) -> (i32, i32) {
    %c0_i32 = arith.constant 0 : i32
    %c0_i32_0 = arith.constant 0 : i32
    %c0_i32_1 = arith.constant 0 : i32
    return %c0_i32, %c0_i32_0 : i32, i32
  }
  func.func @transform_2(%arg0: i32) -> (i32, i32) {
    %c0_i32 = arith.constant 0 : i32
    %c0_i32_0 = arith.constant 0 : i32
    %c0_i32_1 = arith.constant 0 : i32
    return %c0_i32, %c0_i32_0 : i32, i32
  }
  func.func @transform_3(%arg0: i32) -> (i32, i32) {
    %c0_i32 = arith.constant 0 : i32
    %c0_i32_0 = arith.constant 0 : i32
    %c0_i32_1 = arith.constant 0 : i32
    return %c0_i32, %c0_i32_0 : i32, i32
  }
  func.func @transform_4(%arg0: i32) -> (i32, i32) {
    %c0_i32 = arith.constant 0 : i32
    %c0_i32_0 = arith.constant 0 : i32
    %c0_i32_1 = arith.constant 0 : i32
    return %c0_i32, %c0_i32_0 : i32, i32
  }
  func.func @transform_5(%arg0: i32) -> (i32, i32) {
    %c0_i32 = arith.constant 0 : i32
    %c0_i32_0 = arith.constant 0 : i32
    return %arg0, %c0_i32 : i32, i32
  }
}

</mosaic_0001>

<bundles_post_ra>
// kernel: tpu_custom_call.1
= control target key start
LH: loop header
LB: loop body
LE: loop exit
PB: predicated region body
PF: predicated region fallthrough
CT: control target
= control target key end

     0   :  { %10 = vsyncpa [#allocation3], 0  ;;  %s645_s0 = inlined_call_operand.hbm [shape: f32[8,128], index: 0, kind: input, shape index: {}]   ;;  %s646_s1 = inlined_call_operand.hbm [shape: f32[128,128], index: 1, kind: input, shape index: {}]   ;;  %s647_s2 = inlined_call_operand.vmem [shape: f32[1,128], index: 2, kind: input, shape index: {}]   ;;  %s648_s3 = inlined_call_operand.hbm [shape: f32[128,128], index: 3, kind: input, shape index: {}]   ;;  %s649_s4 = inlined_call_operand.vmem [shape: f32[1,128], index: 4, kind: input, shape index: {}]   ;;  %s650_s5 = inlined_call_operand.hbm [shape: f32[8,128], index: 5, kind: output, shape index: {}]  }
   0x1   :  { %11 = vsyncpa [#allocation6], 0 }
   0x2   :  { %12 = vsyncpa [#allocation4], 0  ;;  %s530_s18 = smov [#allocation5]   ;;  %s436_s22 = scalar_lea.hbm %s646_s1, 2048 }
   0x3   :  { %s28_s19 = sshll.u32 %s530_s18, 4  ;;  %p437_p0 = scmp.ne.s32.totalorder %s646_s1, %s436_s22  ;;  %s29_s19 = int_to_ptr.vmem [resolvable:$true] %s28_s19 }
   0x4   :  { %p440_p1 = scmp.lt.u32.totalorder %s436_s22, %s646_s1 }
   0x6   :  { %p442_p2 = pnand %p440_p1, %p437_p0 }
   0x8   :  { %445 = shalt.err (!%p442_p2)
}
   0x9   :  { %s446_s27 = scalar_lea.vmem %s29_s19, 2048  ;;  %p451_p4 = scmp.lt.s32.totalorder %s29_s19, %s29_s19 }
   0xa   :  { %p447_p3 = scmp.ne.s32.totalorder %s29_s19, %s446_s27  ;;  %p452_p5 = scmp.lt.s32.totalorder %s446_s27, %s446_s27 }
   0xc   :  { %p453_p6 = por %p452_p5, %p451_p4 }
   0xe   :  { %p454_p7 = pnand %p453_p6, %p447_p3 }
  0x10   :  { %457 = shalt.err (!%p454_p7)
}
  0x11   :  { %s531_s28 = smov 128   ;;  %s532_s29 = smov 8  }
  0x12   :  { %34 = dma.hbm_to_vmem [thread:$0]  %s646_s1, 2048, %s29_s19, [#allocation6], %s531_s28, %s531_s28, %s532_s29  }
  0x13   :  { %s533_s7 = smov [#allocation2]   ;;  %s534_s9 = smov [#allocation7]  }
  0x14   :  { %s19_s8 = sshll.u32 %s533_s7, 4  ;;  %s42_s10 = sshll.u32 %s534_s9, 4  ;;  %s20_s8 = int_to_ptr.vmem [resolvable:$true] %s19_s8  ;;  %s43_s10 = int_to_ptr.vmem [resolvable:$true] %s42_s10 }
  0x15   :  { %s458_s13 = scalar_lea.hbm %s645_s0, 128 }
  0x16   :  { %p459_p8 = scmp.ne.s32.totalorder %s645_s0, %s458_s13  ;;  %p462_p9 = scmp.lt.u32.totalorder %s458_s13, %s645_s0 }
  0x18   :  { %p464_p10 = pnand %p462_p9, %p459_p8 }
  0x1a   :  { %467 = shalt.err (!%p464_p10)
}
  0x1b   :  { %s468_s1 = scalar_lea.vmem %s20_s8, 128  ;;  %p473_p12 = scmp.lt.s32.totalorder %s20_s8, %s20_s8 }
  0x1c   :  { %p469_p11 = scmp.ne.s32.totalorder %s20_s8, %s468_s1  ;;  %p474_p13 = scmp.lt.s32.totalorder %s468_s1, %s468_s1 }
  0x1e   :  { %p475_p0 = por %p474_p13, %p473_p12 }
  0x20   :  { %p476_p1 = pnand %p475_p0, %p469_p11 }
  0x22   :  { %479 = shalt.err (!%p476_p1)
}
  0x23   :  { %22 = dma.hbm_to_vmem [thread:$0]  %s645_s0, 128, %s20_s8, [#allocation3]  }
  0x24   :  { %s480_s22 = scalar_lea.hbm %s648_s3, 2048 }
  0x25   :  { %p481_p2 = scmp.ne.s32.totalorder %s648_s3, %s480_s22  ;;  %p484_p3 = scmp.lt.u32.totalorder %s480_s22, %s648_s3 }
  0x27   :  { %p486_p4 = pnand %p484_p3, %p481_p2 }
  0x29   :  { %489 = shalt.err (!%p486_p4)
}
  0x2a   :  { %s490_s27 = scalar_lea.vmem %s43_s10, 2048  ;;  %p495_p6 = scmp.lt.s32.totalorder %s43_s10, %s43_s10 }
  0x2b   :  { %p491_p5 = scmp.ne.s32.totalorder %s43_s10, %s490_s27  ;;  %p496_p7 = scmp.lt.s32.totalorder %s490_s27, %s490_s27 }
  0x2d   :  { %p497_p8 = por %p496_p7, %p495_p6 }
  0x2f   :  { %p498_p9 = pnand %p497_p8, %p491_p5 }
  0x31   :  { %501 = shalt.err (!%p498_p9)
}
  0x32   :  { %48 = dma.hbm_to_vmem [thread:$0]  %s648_s3, 2048, %s43_s10, [#allocation6], %s531_s28, %s531_s28, %s532_s29  }
  0x33   :  { %524 = dma.done.wait [#allocation3], 128  }
  0x34   :  { %525 = vsyncadd [#allocation3], 4294967168 }
  0x35   :  { %526 = dma.done.wait [#allocation6], 4096  }
  0x36   :  { %527 = vsyncadd [#allocation6], 4294963200  ;;  %v535_v0 = vmov 0.0|0.0   ;;  %vm536_vm0 = vmmov 0   ;;  %v537_v1 = vmov 0.0   ;;  %v61_v2 = vld [vmem:[#allocation5] sm:$0xff] }
  0x37   :  { %377 = vmatprep.subr.bf16.mxu0 %v535_v0  ;;  %339 = vmatprep.mubr.msk.f32.mxu0 %vm536_vm0, %v537_v1  ;;  %v62_v3 = vld [vmem:[#allocation5 + $0x8] sm:$0xff]  ;;  %v63_v4 = vld [vmem:[#allocation5 + $0x10] sm:$0xff]  ;;  %v64_v6 = vld [vmem:[#allocation5 + $0x18] sm:$0xff]  ;;  %s538_s7 = smov [#allocation8]  }
  0x38   :  { %401 = vmatprep.subr.bf16.mxu1 %v535_v0  ;;  %374 = vmatprep.mubr.msk.f32.mxu1 %vm536_vm0, %v537_v1  ;;  %v378_v5 = vpack.c.bf16 %v62_v3, %v61_v2  ;;  %v381_v7 = vpack.c.bf16 %v64_v6, %v63_v4  ;;  %v65_v8 = vld [vmem:[#allocation5 + $0x20] sm:$0xff]  ;;  %v66_v9 = vld [vmem:[#allocation5 + $0x28] sm:$0xff]  ;;  %v162_v12 = vld [vmem:[#allocation7 + $0x10] sm:$0xff]  ;;  %s261_s8 = sshll.u32 %s538_s7, 4  ;;  %s262_s8 = int_to_ptr.vmem [resolvable:$true] %s261_s8 }
  0x39   :  { %v160_v10 = vld [vmem:[#allocation7] sm:$0xff]  ;;  %v161_v11 = vld [vmem:[#allocation7 + $0x8] sm:$0xff]  ;;  %v163_v13 = vld [vmem:[#allocation7 + $0x18] sm:$0xff]  ;;  %v384_v14 = vpack.c.bf16 %v66_v9, %v65_v8  ;;  %p507_p11 = scmp.lt.s32.totalorder %s262_s8, %s262_s8 }
  0x3a   :  { %379 = vmatpush3.bf16.msra.mxu0 %v378_v5  ;;  %v402_v15 = vpack.c.bf16 %v161_v11, %v160_v10  ;;  %v67_v16 = vld [vmem:[#allocation5 + $0x30] sm:$0xff]  ;;  %v68_v17 = vld [vmem:[#allocation5 + $0x38] sm:$0xff]  ;;  %v405_v18 = vpack.c.bf16 %v163_v13, %v162_v12  ;;  %v164_v19 = vld [vmem:[#allocation7 + $0x20] sm:$0xff] }
  0x3b   :  { %380 = vmatprep.subr.bf16.mxu0 %v535_v0  ;;  %v165_v20 = vld [vmem:[#allocation7 + $0x28] sm:$0xff]  ;;  %v387_v21 = vpack.c.bf16 %v68_v17, %v67_v16  ;;  %v69_v22 = vld [vmem:[#allocation5 + $0x40] sm:$0xff]  ;;  %v71_v26 = vld [vmem:[#allocation5 + $0x50] sm:$0xff] }
  0x3c   :  { %403 = vmatpush3.bf16.msra.mxu1 %v402_v15  ;;  %v70_v23 = vld [vmem:[#allocation5 + $0x48] sm:$0xff]  ;;  %v408_v24 = vpack.c.bf16 %v165_v20, %v164_v19  ;;  %v72_v27 = vld [vmem:[#allocation5 + $0x58] sm:$0xff]  ;;  %v73_v29 = vld [vmem:[#allocation5 + $0x60] sm:$0xff] }
  0x3d   :  { %404 = vmatprep.subr.bf16.mxu1 %v535_v0  ;;  %v390_v25 = vpack.c.bf16 %v70_v23, %v69_v22  ;;  %v393_v28 = vpack.c.bf16 %v72_v27, %v71_v26  ;;  %v74_v30 = vld [vmem:[#allocation5 + $0x68] sm:$0xff]  ;;  %v75_v32 = vld [vmem:[#allocation5 + $0x70] sm:$0xff]  ;;  %v76_v33 = vld [vmem:[#allocation5 + $0x78] sm:$0xff] }
  0x3e   :  { %382 = vmatpush3.bf16.msra.mxu0 %v381_v7  ;;  %v396_v31 = vpack.c.bf16 %v74_v30, %v73_v29  ;;  %v399_v34 = vpack.c.bf16 %v76_v33, %v75_v32  ;;  %v60_v35 = vld [vmem:[#allocation2] sm:$0xff]  ;;  %v166_v36 = vld [vmem:[#allocation7 + $0x30] sm:$0xff]  ;;  %v168_v39 = vld [vmem:[#allocation7 + $0x40] sm:$0xff] }
  0x3f   :  { %383 = vmatprep.subr.bf16.mxu0 %v535_v0  ;;  %v167_v37 = vld [vmem:[#allocation7 + $0x38] sm:$0xff]  ;;  %v169_v40 = vld [vmem:[#allocation7 + $0x48] sm:$0xff]  ;;  %v170_v42 = vld [vmem:[#allocation7 + $0x50] sm:$0xff] }
  0x40   :  { %406 = vmatpush3.bf16.msra.mxu1 %v405_v18  ;;  %v411_v38 = vpack.c.bf16 %v167_v37, %v166_v36  ;;  %v414_v41 = vpack.c.bf16 %v169_v40, %v168_v39  ;;  %v171_v43 = vld [vmem:[#allocation7 + $0x58] sm:$0xff]  ;;  %v172_v45 = vld [vmem:[#allocation7 + $0x60] sm:$0xff]  ;;  %v173_v46 = vld [vmem:[#allocation7 + $0x68] sm:$0xff] }
  0x41   :  { %407 = vmatprep.subr.bf16.mxu1 %v535_v0  ;;  %v417_v44 = vpack.c.bf16 %v171_v43, %v170_v42  ;;  %v420_v47 = vpack.c.bf16 %v173_v46, %v172_v45  ;;  %v174_v48 = vld [vmem:[#allocation7 + $0x70] sm:$0xff]  ;;  %v175_v49 = vld [vmem:[#allocation7 + $0x78] sm:$0xff] }
  0x42   :  { %385 = vmatpush3.bf16.msra.mxu0 %v384_v14  ;;  %v423_v50 = vpack.c.bf16 %v175_v49, %v174_v48  ;;  %v271_v51 = vld [vmem:[%s647_s2] ss:$0 sm:$0xff]  ;;  %s502_s2 = scalar_lea.vmem %s262_s8, 128 }
  0x43   :  { %386 = vmatprep.subr.bf16.mxu0 %v535_v0  ;;  %v272_v61 = vld [vmem:[%s649_s4] ss:$0 sm:$0xff]  ;;  %p503_p10 = scmp.ne.s32.totalorder %s262_s8, %s502_s2  ;;  %p508_p12 = scmp.lt.s32.totalorder %s502_s2, %s502_s2 }
  0x44   :  { %409 = vmatpush3.bf16.msra.mxu1 %v408_v24 }
  0x45   :  { %410 = vmatprep.subr.bf16.mxu1 %v535_v0  ;;  %p509_p13 = por %p508_p12, %p507_p11 }
  0x46   :  { %388 = vmatpush3.bf16.msra.mxu0 %v387_v21 }
  0x47   :  { %389 = vmatprep.subr.bf16.mxu0 %v535_v0  ;;  %p510_p0 = pnand %p509_p13, %p503_p10 }
  0x48   :  { %412 = vmatpush3.bf16.msra.mxu1 %v411_v38 }
  0x49   :  { %413 = vmatprep.subr.bf16.mxu1 %v535_v0 }
  0x4a   :  { %391 = vmatpush3.bf16.msra.mxu0 %v390_v25 }
  0x4b   :  { %392 = vmatprep.subr.bf16.mxu0 %v535_v0 }
  0x4c   :  { %415 = vmatpush3.bf16.msra.mxu1 %v414_v41 }
  0x4d   :  { %416 = vmatprep.subr.bf16.mxu1 %v535_v0 }
  0x4e   :  { %394 = vmatpush3.bf16.msra.mxu0 %v393_v28 }
  0x4f   :  { %395 = vmatprep.subr.bf16.mxu0 %v535_v0 }
  0x50   :  { %418 = vmatpush3.bf16.msra.mxu1 %v417_v44 }
  0x51   :  { %419 = vmatprep.subr.bf16.mxu1 %v535_v0 }
  0x52   :  { %397 = vmatpush3.bf16.msra.mxu0 %v396_v31 }
  0x53   :  { %398 = vmatprep.subr.bf16.mxu0 %v535_v0 }
  0x54   :  { %421 = vmatpush3.bf16.msra.mxu1 %v420_v47 }
  0x55   :  { %422 = vmatprep.subr.bf16.mxu1 %v535_v0 }
  0x56   :  { %400 = vmatpush3.bf16.msra.mxu0 %v399_v34 }
  0x58   :  { %424 = vmatpush3.bf16.msra.mxu1 %v423_v50 }
  0x59   :  { %340 = vmatmul.mubr.f32.vlgmr.msra.gmra.mrb[0].mxu0 %v60_v35 }
 0x12c   :  { %v150_v52 = vpop.f32.mrb[0].mxu0 }
 0x12d   :  { %v151_v53 = vadd.f32 %v271_v51, %v150_v52  ;;  %v341_v54 = vpop.f32.mrb[1].mxu0 }
 0x12f   :  { %v155_v55 = vmul.f32 0.70710677, %v151_v53  ;;  %v154_v57 = vmul.f32 0.5, %v151_v53 }
 0x131   :  { %434 = verf.f32 %v155_v55 }
 0x13b   :  { %v435_v56 = vpop.eup %434 }
 0x13c   :  { %v157_v58 = vadd.f32 1.0, %v435_v56 }
 0x13e   :  { %v158_v59 = vmul.f32 %v157_v58, %v154_v57 }
 0x140   :  { %v159_v60 = vadd.f32 %v158_v59, %v60_v35 }
 0x142   :  { %375 = vmatmul.mubr.f32.vlgmr.msra.gmra.mrb[0].mxu1 %v159_v60 }
 0x215   :  { %v249_v62 = vpop.f32.mrb[0].mxu1 }
 0x216   :  { %v250_v63 = vadd.f32 %v272_v61, %v249_v62  ;;  %v376_v0 = vpop.f32.mrb[1].mxu1 }
 0x218   :  { %v253_v1 = vadd.f32 %v250_v63, %v159_v60 }
 0x21a   :  { %254 = vst [vmem:[#allocation8] sm:$0xff] %v253_v1 }
 0x21b   :  { %513 = shalt.err (!%p510_p0)
}
 0x21c   :  { %s514_s11 = scalar_lea.hbm %s650_s5, 128 }
 0x21d   :  { %p515_p1 = scmp.ne.s32.totalorder %s650_s5, %s514_s11  ;;  %p518_p2 = scmp.lt.u32.totalorder %s514_s11, %s650_s5 }
 0x21f   :  { %p520_p3 = pnand %p518_p2, %p515_p1 }
 0x221   :  { %523 = shalt.err (!%p520_p3)
}
 0x222   :  { %264 = dma.vmem_to_hbm [thread:$0]  %s262_s8, 128, %s650_s5, [#allocation4]  }
 0x223   :  { %528 = dma.done.wait [#allocation4], 128  }
 0x224   :  { %529 = vsyncadd [#allocation4], 4294967168 }
 0x225   :  { %268 = vsyncpa [#allocation3], 1 }
 0x226   :  { %269 = vsyncpa [#allocation6], 1 }
 0x227   :  { %270 = vsyncpa [#allocation4], 1 }

</bundles_post_ra>
